<compile_context>
chip_gen: v5e
topology: v5e:2x2
jax: 0.10.0
libtpu: 0.0.40
codegen_flags: <defaults>
</compile_context>

<pallas_src>
import functools

import jax
import jax.numpy as jnp
from jax.experimental import pallas as pl
from jax.experimental.pallas import tpu as pltpu


def _round_up(x, m):
    return (x + m - 1) // m * m


def _center_loss_kernel(feat_ref, center_ref, label_ref, lam_ref, out_ref,
                        s_acc, c_acc, *, C, D, N, TN):
    i = pl.program_id(0)

    @pl.when(i == 0)
    def _init():
        s_acc[...] = jnp.zeros_like(s_acc)
        c_acc[...] = jnp.zeros_like(c_acc)

    # One-hot in (C, TN) layout: classes on sublanes, samples on lanes.
    # Padded columns carry label = -1 and therefore an all-zero one-hot column.
    lbl = label_ref[...]                                            # (1, TN) i32
    class_ids = jax.lax.broadcasted_iota(jnp.int32, (C, TN), 0)     # (C, TN)
    onehot = (class_ids == lbl).astype(jnp.float32)                 # (C, TN)

    feat = feat_ref[...]                                            # (D, TN) f32

    if D <= 8 or TN < 128:
        # VPU gather path (tiny D): per feature dim, gather center row via an
        # onehot-weighted sublane sum and fold the squared diff immediately.
        sq = jnp.zeros((1, TN), jnp.float32)
        for d in range(D):
            col = center_ref[:, d:d + 1]                            # (C, 1)
            ce_d = jnp.sum(onehot * col, axis=0, keepdims=True)     # (1, TN)
            diff = feat[d:d + 1, :] - ce_d
            sq = sq + diff * diff                                   # (1, TN)
    else:
        # MXU gather path: lane-dense (D, TN) output.
        center_exp = jax.lax.dot_general(
            center_ref[...], onehot,
            dimension_numbers=(((0,), (0,)), ((), ())),
            preferred_element_type=jnp.float32)                     # (D, TN)
        diff = feat - center_exp
        sq = jnp.sum(diff * diff, axis=0, keepdims=True)            # (1, TN)

    # Per-class partial sums for this tile (lane reductions over TN).
    s_acc[...] += jnp.sum(onehot * sq, axis=1, keepdims=True)       # (C, 1)
    c_acc[...] += jnp.sum(onehot, axis=1, keepdims=True)            # (C, 1)

    @pl.when(i == pl.num_programs(0) - 1)
    def _finalize():
        cnt = c_acc[...]
        safe_cnt = jnp.where(cnt > 0.0, cnt, 1.0)
        per_class = jnp.where(cnt > 0.0, s_acc[...] / safe_cnt, 0.0)
        scale = lam_ref[0, 0] * (0.5 / N)                           # lam/2 * 1/N
        out_ref[0, 0] = scale * jnp.sum(per_class)


def center_loss_pallas(feature, label, lambdas, center, *, tile_n=1024):
    feature = feature.astype(jnp.float32)
    center = center.astype(jnp.float32)
    N, D = feature.shape
    C, Dc = center.shape
    assert D == Dc

    # Layout plumbing: put N on the lane axis.
    feat_t = feature.T                                   # (D, N)
    lbl = label.astype(jnp.int32).reshape(1, N)          # (1, N)

    # Choose an N tile (multiple of 8; multiple of 128 when tiling is needed).
    if N <= tile_n:
        tn = _round_up(N, 8)
        n_pad = tn
    else:
        tn = tile_n
        n_pad = _round_up(N, tn)
    if n_pad != N:
        feat_t = jnp.pad(feat_t, ((0, 0), (0, n_pad - N)))
        lbl = jnp.pad(lbl, ((0, 0), (0, n_pad - N)), constant_values=-1)

    lam = jnp.asarray(lambdas, dtype=jnp.float32).reshape(1, 1)
    grid = (n_pad // tn,)

    out = pl.pallas_call(
        functools.partial(_center_loss_kernel, C=C, D=D, N=N, TN=tn),
        out_shape=jax.ShapeDtypeStruct((1, 1), jnp.float32),
        grid=grid,
        in_specs=[
            pl.BlockSpec((D, tn), lambda i: (0, i)),                 # feature^T tile
            pl.BlockSpec((C, D), lambda i: (0, 0)),                  # center (resident)
            pl.BlockSpec((1, tn), lambda i: (0, i)),                 # label tile
            pl.BlockSpec(memory_space=pltpu.MemorySpace.SMEM),       # lambdas scalar
        ],
        out_specs=pl.BlockSpec(memory_space=pltpu.MemorySpace.SMEM),  # (1,1) loss
        scratch_shapes=[
            pltpu.VMEM((C, 1), jnp.float32),   # per-class sum of squared distances
            pltpu.VMEM((C, 1), jnp.float32),   # per-class counts
        ],
        compiler_params=pltpu.CompilerParams(
            dimension_semantics=("arbitrary",),   # accumulator across N tiles
            vmem_limit_bytes=32 * 1024 * 1024,    # stays well within v7x's 64 MiB
        ),
    )(feat_t, center, lbl, lam)
    return out[0, 0]


def center_loss_ref(feature, label, lambdas, center):
    # Pure-JAX reference mirroring the PyTorch forward.
    lbl = label.astype(jnp.int32)
    center_exp = center[lbl]                                        # (N, D)
    n_bins = int(jnp.max(lbl)) + 1
    count = jnp.bincount(lbl, length=n_bins).astype(jnp.float32)
    count_exp = count[lbl]
    per_sample = jnp.sum((feature - center_exp) ** 2, axis=1) / count_exp
    return lambdas / 2.0 * jnp.mean(per_sample)


if __name__ == "__main__":
    key = jax.random.PRNGKey(0)
    k_center, k_feat, k_label = jax.random.split(key, 3)

    NUM_CLASSES, FEAT_DIM, BATCH = 10, 2, 8

    # Deterministic "parameter" init (module has nn.Parameter(torch.randn(10, 2))).
    center = jax.random.normal(k_center, (NUM_CLASSES, FEAT_DIM), dtype=jnp.float32)

    feature = jax.random.normal(k_feat, (BATCH, FEAT_DIM), dtype=jnp.float32)
    label = jax.random.randint(k_label, (BATCH,), 0, NUM_CLASSES, dtype=jnp.int32)
    lambdas = 2.0

    loss = center_loss_pallas(feature, label, lambdas, center)
    loss = jax.block_until_ready(loss)

    ref = center_loss_ref(feature, label, lambdas, center)
    assert jnp.allclose(loss, ref, rtol=1e-5, atol=1e-5), (loss, ref)

    print("KERNEL_OK")
</pallas_src>

<mosaic_0001>
module attributes {stable_mosaic.version = 11 : i64} {
  func.func @_center_loss_kernel(%arg0: i32, %arg1: memref<2x8xf32, #tpu.memory_space<vmem>>, %arg2: memref<10x2xf32, #tpu.memory_space<vmem>>, %arg3: memref<1x8xi32, #tpu.memory_space<vmem>>, %arg4: memref<1x1xf32, #tpu.memory_space<smem>>, %arg5: memref<1x1xf32, #tpu.memory_space<smem>>, %arg6: memref<10x1xf32, #tpu.memory_space<vmem>>, %arg7: memref<10x1xf32, #tpu.memory_space<vmem>>) attributes {dimension_semantics = [#tpu.dimension_semantics<arbitrary>], iteration_bounds = array<i64: 1>, scalar_prefetch = 0 : i64, scratch_operands = 2 : i64, tpu.core_type = #tpu.core_type<tc>, window_params = [{transform_indices = @transform_0, window_bounds = array<i64: 2, 8>}, {pipeline_mode = #tpu.pipeline_mode<synchronous>, transform_indices = @transform_1, window_bounds = array<i64: 10, 2>}, {transform_indices = @transform_2, window_bounds = array<i64: 1, 8>}, {transform_indices = @transform_3, window_bounds = array<i64: 1, 1>}, {transform_indices = @transform_4, window_bounds = array<i64: 1, 1>}]} {
    %c0_i32 = arith.constant 0 : i32
    %0 = arith.cmpi eq, %arg0, %c0_i32 : i32
    %1 = arith.extui %0 : i1 to i32
    %c0_i32_0 = arith.constant 0 : i32
    %2 = arith.cmpi ne, %1, %c0_i32_0 : i32
    scf.if %2 {
      %cst_21 = arith.constant 0.000000e+00 : f32
      %44 = vector.broadcast %cst_21 : f32 to vector<10x1xf32>
      %c0_22 = arith.constant 0 : index
      %c0_23 = arith.constant 0 : index
      %45 = vector.load %arg6[%c0_22, %c0_23] : memref<10x1xf32, #tpu.memory_space<vmem>>, vector<10x1xf32>
      tpu.vector_store %arg6[%c0_22, %c0_23], %44 {strides = array<i32>} : memref<10x1xf32, #tpu.memory_space<vmem>>, vector<10x1xf32>,
      %cst_24 = arith.constant 0.000000e+00 : f32
      %46 = vector.broadcast %cst_24 : f32 to vector<10x1xf32>
      %c0_25 = arith.constant 0 : index
      %c0_26 = arith.constant 0 : index
      %47 = vector.load %arg7[%c0_25, %c0_26] : memref<10x1xf32, #tpu.memory_space<vmem>>, vector<10x1xf32>
      tpu.vector_store %arg7[%c0_25, %c0_26], %46 {strides = array<i32>} : memref<10x1xf32, #tpu.memory_space<vmem>>, vector<10x1xf32>,
    } else {
    }
    %c0 = arith.constant 0 : index
    %c0_1 = arith.constant 0 : index
    %3 = vector.load %arg3[%c0, %c0_1] : memref<1x8xi32, #tpu.memory_space<vmem>>, vector<1x8xi32>
    %4 = tpu.iota {dimensions = array<i32: 0>} : vector<10x8xi32>
    %5 = vector.broadcast %3 : vector<1x8xi32> to vector<10x8xi32>
    %6 = arith.cmpi eq, %4, %5 : vector<10x8xi32>
    %7 = arith.extui %6 : vector<10x8xi1> to vector<10x8xi32>
    %8 = arith.sitofp %7 : vector<10x8xi32> to vector<10x8xf32>
    %c0_2 = arith.constant 0 : index
    %c0_3 = arith.constant 0 : index
    %9 = vector.load %arg1[%c0_2, %c0_3] : memref<2x8xf32, #tpu.memory_space<vmem>>, vector<2x8xf32>
    %cst = arith.constant 0.000000e+00 : f32
    %10 = vector.broadcast %cst : f32 to vector<1x8xf32>
    %c0_4 = arith.constant 0 : index
    %c0_5 = arith.constant 0 : index
    %11 = vector.load %arg2[%c0_4, %c0_5] : memref<10x2xf32, #tpu.memory_space<vmem>>, vector<10x1xf32>
    %12 = vector.broadcast %11 : vector<10x1xf32> to vector<10x8xf32>
    %13 = arith.mulf %8, %12 : vector<10x8xf32>
    %cst_6 = arith.constant dense<0.000000e+00> : vector<8xf32>
    %14 = vector.multi_reduction <add>, %13, %cst_6 [0] : vector<10x8xf32> to vector<8xf32>
    %15 = vector.shape_cast %14 : vector<8xf32> to vector<1x8xf32>
    %16 = vector.extract_strided_slice %9 {offsets = [0, 0], sizes = [1, 8], strides = [1, 1]} : vector<2x8xf32> to vector<1x8xf32>
    %17 = arith.subf %16, %15 : vector<1x8xf32>
    %18 = arith.mulf %17, %17 : vector<1x8xf32>
    %19 = arith.addf %10, %18 : vector<1x8xf32>
    %c0_7 = arith.constant 0 : index
    %c1 = arith.constant 1 : index
    %20 = vector.load %arg2[%c0_7, %c1] : memref<10x2xf32, #tpu.memory_space<vmem>>, vector<10x1xf32>
    %21 = vector.broadcast %20 : vector<10x1xf32> to vector<10x8xf32>
    %22 = arith.mulf %8, %21 : vector<10x8xf32>
    %cst_8 = arith.constant dense<0.000000e+00> : vector<8xf32>
    %23 = vector.multi_reduction <add>, %22, %cst_8 [0] : vector<10x8xf32> to vector<8xf32>
    %24 = vector.shape_cast %23 : vector<8xf32> to vector<1x8xf32>
    %25 = vector.extract_strided_slice %9 {offsets = [1, 0], sizes = [1, 8], strides = [1, 1]} : vector<2x8xf32> to vector<1x8xf32>
    %26 = arith.subf %25, %24 : vector<1x8xf32>
    %27 = arith.mulf %26, %26 : vector<1x8xf32>
    %28 = arith.addf %19, %27 : vector<1x8xf32>
    %c0_9 = arith.constant 0 : index
    %c0_10 = arith.constant 0 : index
    %29 = vector.load %arg6[%c0_9, %c0_10] : memref<10x1xf32, #tpu.memory_space<vmem>>, vector<10x1xf32>
    %30 = vector.broadcast %28 : vector<1x8xf32> to vector<10x8xf32>
    %31 = arith.mulf %8, %30 : vector<10x8xf32>
    %cst_11 = arith.constant dense<0.000000e+00> : vector<10xf32>
    %32 = vector.multi_reduction <add>, %31, %cst_11 [1] : vector<10x8xf32> to vector<10xf32>
    %33 = vector.shape_cast %32 : vector<10xf32> to vector<10x1xf32>
    %34 = arith.addf %29, %33 : vector<10x1xf32>
    %c0_12 = arith.constant 0 : index
    %c0_13 = arith.constant 0 : index
    %35 = vector.load %arg6[%c0_12, %c0_13] : memref<10x1xf32, #tpu.memory_space<vmem>>, vector<10x1xf32>
    tpu.vector_store %arg6[%c0_12, %c0_13], %34 {strides = array<i32>} : memref<10x1xf32, #tpu.memory_space<vmem>>, vector<10x1xf32>,
    %c0_14 = arith.constant 0 : index
    %c0_15 = arith.constant 0 : index
    %36 = vector.load %arg7[%c0_14, %c0_15] : memref<10x1xf32, #tpu.memory_space<vmem>>, vector<10x1xf32>
    %cst_16 = arith.constant dense<0.000000e+00> : vector<10xf32>
    %37 = vector.multi_reduction <add>, %8, %cst_16 [1] : vector<10x8xf32> to vector<10xf32>
    %38 = vector.shape_cast %37 : vector<10xf32> to vector<10x1xf32>
    %39 = arith.addf %36, %38 : vector<10x1xf32>
    %c0_17 = arith.constant 0 : index
    %c0_18 = arith.constant 0 : index
    %40 = vector.load %arg7[%c0_17, %c0_18] : memref<10x1xf32, #tpu.memory_space<vmem>>, vector<10x1xf32>
    tpu.vector_store %arg7[%c0_17, %c0_18], %39 {strides = array<i32>} : memref<10x1xf32, #tpu.memory_space<vmem>>, vector<10x1xf32>,
    %c0_i32_19 = arith.constant 0 : i32
    %41 = arith.cmpi eq, %arg0, %c0_i32_19 : i32
    %42 = arith.extui %41 : i1 to i32
    %c0_i32_20 = arith.constant 0 : i32
    %43 = arith.cmpi ne, %42, %c0_i32_20 : i32
    scf.if %43 {
      %c0_21 = arith.constant 0 : index
      %c0_22 = arith.constant 0 : index
      %44 = vector.load %arg7[%c0_21, %c0_22] : memref<10x1xf32, #tpu.memory_space<vmem>>, vector<10x1xf32>
      %cst_23 = arith.constant 0.000000e+00 : f32
      %45 = vector.broadcast %cst_23 : f32 to vector<10x1xf32>
      %46 = arith.cmpf ogt, %44, %45 : vector<10x1xf32>
      %cst_24 = arith.constant 1.000000e+00 : f32
      %47 = vector.broadcast %cst_24 : f32 to vector<10x1xf32>
      %48 = arith.select %46, %44, %47 : vector<10x1xi1>, vector<10x1xf32>
      %cst_25 = arith.constant 0.000000e+00 : f32
      %49 = vector.broadcast %cst_25 : f32 to vector<10x1xf32>
      %50 = arith.cmpf ogt, %44, %49 : vector<10x1xf32>
      %c0_26 = arith.constant 0 : index
      %c0_27 = arith.constant 0 : index
      %51 = vector.load %arg6[%c0_26, %c0_27] : memref<10x1xf32, #tpu.memory_space<vmem>>, vector<10x1xf32>
      %52 = arith.divf %51, %48 : vector<10x1xf32>
      %cst_28 = arith.constant 0.000000e+00 : f32
      %53 = vector.broadcast %cst_28 : f32 to vector<10x1xf32>
      %54 = arith.select %50, %52, %53 : vector<10x1xi1>, vector<10x1xf32>
      %c0_29 = arith.constant 0 : index
      %c0_30 = arith.constant 0 : index
      %55 = memref.load %arg4[%c0_29, %c0_30] : memref<1x1xf32, #tpu.memory_space<smem>>
      %cst_31 = arith.constant 6.250000e-02 : f32
      %56 = arith.mulf %55, %cst_31 : f32
      %57 = vector.shape_cast %54 : vector<10x1xf32> to vector<1x10x1xf32>
      %cst_32 = arith.constant dense<0.000000e+00> : vector<1xf32>
      %58 = vector.multi_reduction <add>, %57, %cst_32 [1, 2] : vector<1x10x1xf32> to vector<1xf32>
      %59 = vector.shape_cast %58 : vector<1xf32> to vector<1x1x1xf32>
      %60 = vector.extract %59[0, 0, 0] : f32 from vector<1x1x1xf32>
      %61 = arith.mulf %56, %60 : f32
      %c0_33 = arith.constant 0 : index
      %c0_34 = arith.constant 0 : index
      %62 = memref.load %arg5[%c0_33, %c0_34] : memref<1x1xf32, #tpu.memory_space<smem>>
      memref.store %61, %arg5[%c0_33, %c0_34] : memref<1x1xf32, #tpu.memory_space<smem>>
    } else {
    }
    return
  }
  func.func @transform_0(%arg0: i32) -> (i32, i32) {
    %c0_i32 = arith.constant 0 : i32
    %c0_i32_0 = arith.constant 0 : i32
    return %c0_i32, %arg0 : i32, i32
  }
  func.func @transform_1(%arg0: i32) -> (i32, i32) {
    %c0_i32 = arith.constant 0 : i32
    %c0_i32_0 = arith.constant 0 : i32
    %c0_i32_1 = arith.constant 0 : i32
    return %c0_i32, %c0_i32_0 : i32, i32
  }
  func.func @transform_2(%arg0: i32) -> (i32, i32) {
    %c0_i32 = arith.constant 0 : i32
    %c0_i32_0 = arith.constant 0 : i32
    return %c0_i32, %arg0 : i32, i32
  }
  func.func @transform_3(%arg0: i32) -> (i32, i32) {
    %c0_i32 = arith.constant 0 : i32
    %c0_i32_0 = arith.constant 0 : i32
    %c0_i32_1 = arith.constant 0 : i32
    return %c0_i32, %c0_i32_0 : i32, i32
  }
  func.func @transform_4(%arg0: i32) -> (i32, i32) {
    %c0_i32 = arith.constant 0 : i32
    %c0_i32_0 = arith.constant 0 : i32
    %c0_i32_1 = arith.constant 0 : i32
    return %c0_i32, %c0_i32_0 : i32, i32
  }
}

</mosaic_0001>

<bundles_post_ra>
// kernel: tpu_custom_call.1
= control target key start
LH: loop header
LB: loop body
LE: loop exit
PB: predicated region body
PF: predicated region fallthrough
CT: control target
= control target key end

     0   :  { %v30_v1 = vlaneseq  ;;  %v227_v2 = vmov 1   ;;  %v228_v3 = vmov 0   ;;  %s296_s0 = inlined_call_operand.vmem [shape: f32[2,8], index: 0, kind: input, shape index: {}]   ;;  %s297_s1 = inlined_call_operand.vmem [shape: f32[10,2], index: 1, kind: input, shape index: {}]   ;;  %s298_s2 = inlined_call_operand.vmem [shape: s32[1,8], index: 2, kind: input, shape index: {}]   ;;  %s299_s3 = inlined_call_operand.<no memory space> [shape: f32[1,1], index: 3, kind: input, shape index: {}]   ;;  %s300_s4 = inlined_call_operand.hbm [shape: f32[1,1], index: 4, kind: output, shape index: {}]  }
   0x1   :  { %v41_v0 = vld [vmem:[%s297_s1] sm:$0xff]  ;;  %206 = vset.pattern.permute.xlu0 %v227_v2  ;;  %207 = vset.pattern.permute.xlu1 %v228_v3 }
   0x2   :  { %v208_v4 = vld [vmem:[%s298_s2] ss:$0 sm:$0xff]  ;;  %45 = vperm.xlu1 %207, %v41_v0   ;;  %70 = vperm.xlu0 %206, %v41_v0   ;;  %v31_v5 = vshrl.u32 %v30_v1, 7 }
   0x3   :  { %10 = vsyncpa [#allocation6], 0  ;;  %vm55_vm0 = vcmask 64512   ;;  %v229_v6 = vmov 0.0   ;;  %v42_v9 = vld [vmem:[%s297_s1 + $0x8] sm:$0x3] }
   0x4   :  { %vm34_vm1 = vcmp.eq.s32.totalorder %v31_v5, %v208_v4  ;;  %v32_v10 = vadd.s32 8, %v31_v5  ;;  %vm57_vm3 = vcmask 58368   ;;  %vm23_vm4 = vcmask 7168   ;;  %v40_v40 = vld [vmem:[%s296_s0] sm:$0x3]  ;;  %s167_s22 = smul.f32 0.0625, %s299_s3 }
   0x5   :  { %v198_v7 = vsel %vm34_vm1, 1.0, %v229_v6  ;;  %vm25_vm5 = vcmask 1024   ;;  %27 = vst.msk [vmem:[#allocation3] sm:$0xff] %vm23_vm4, %v229_v6  ;;  %s188_s25 = sshll.u32 %s300_s4, 4  ;;  %s230_s28 = smov [#allocation5]   ;;  %s189_s25 = int_to_ptr.hbm [resolvable:$true] %s188_s25 }
   0x6   :  { %v113_v8 = vsel %vm55_vm0, %v198_v7, 0.0  ;;  %vm35_vm2 = vcmp.eq.s32.totalorder %v32_v10, %v208_v4  ;;  %24 = vst.msk [vmem:[#allocation2] sm:$0xff] %vm23_vm4, %v229_v6 }
   0x7   :  { %114 = vadd.xlane.f32.xlu2 %v113_v8  ;;  %v199_v11 = vsel %vm35_vm2, 1.0, %v229_v6  ;;  %28 = vst.msk [vmem:[#allocation3 + $0x8] sm:$0x3] %vm25_vm5, %v229_v6 }
   0x8   :  { %v116_v12 = vsel %vm57_vm3, %v199_v11, 0.0  ;;  %26 = vst.msk [vmem:[#allocation2 + $0x8] sm:$0x3] %vm25_vm5, %v229_v6 }
   0xa   :  { %50 = vperm.xlu1 %207, %v42_v9   ;;  %74 = vperm.xlu0 %206, %v42_v9  }
   0xc   :  { %v111_v30 = vld [vmem:[#allocation3] sm:$0xff] }
   0xd   :  { %v94_v4 = vld [vmem:[#allocation2] sm:$0xff] }
   0xe   :  { %v112_v54 = vld [vmem:[#allocation3 + $0x8] sm:$0x3] }
   0xf   :  { %117 = vadd.xlane.f32.xlu2 %v116_v12  ;;  %v95_v3 = vld [vmem:[#allocation2 + $0x8] sm:$0x3] }
  0x74   :  { %v46_v13 = vpop.permute.xlu1 %45  ;;  %v71_v14 = vpop.permute.xlu0 %70 }
  0x75   :  { %v53_v15 = vmul.f32 %v198_v7, %v46_v13  ;;  %v77_v16 = vmul.f32 %v198_v7, %v71_v14 }
  0x77   :  { %v56_v21 = vsel %vm55_vm0, %v53_v15, 0.0  ;;  %v79_v22 = vsel %vm55_vm0, %v77_v16, 0.0 }
  0x7a   :  { %v115_v27 = vpop.xlane.xlu2 %114 }
  0x7b   :  { %v119_v33 = vadd.f32 %v115_v27, %v111_v30 }
  0x7c   :  { %v51_v17 = vpop.permute.xlu1 %50  ;;  %v75_v18 = vpop.permute.xlu0 %74 }
  0x7d   :  { %v54_v19 = vmul.f32 %v199_v11, %v51_v17  ;;  %v78_v20 = vmul.f32 %v199_v11, %v75_v18  ;;  %121 = vst.msk [vmem:[#allocation3] sm:$0xff] %vm23_vm4, %v119_v33 }
  0x7f   :  { %v58_v23 = vsel %vm57_vm3, %v54_v19, 0.0  ;;  %v80_v24 = vsel %vm57_vm3, %v78_v20, 0.0 }
  0x80   :  { %v59_v25 = vadd.f32 %v58_v23, %v56_v21  ;;  %v81_v26 = vadd.f32 %v80_v24, %v79_v22 }
  0x82   :  { %v60_v28 = vrot.slane %v59_v25, 4  ;;  %v82_v29 = vrot.slane %v81_v26, 4  ;;  %v118_v55 = vpop.xlane.xlu2 %117 }
  0x83   :  { %v120_v56 = vadd.f32 %v118_v55, %v112_v54 }
  0x84   :  { %v61_v31 = vadd.f32 %v60_v28, %v59_v25  ;;  %v83_v32 = vadd.f32 %v82_v29, %v81_v26  ;;  %v126_v58 = vld [vmem:[#allocation3] sm:$0xff] }
  0x85   :  { %122 = vst.msk [vmem:[#allocation3 + $0x8] sm:$0x3] %vm25_vm5, %v120_v56  ;;  %vm128_vm7 = vcmp.gt.f32.partialorder %v126_v58, 0.0 }
  0x86   :  { %v62_v34 = vrot.slane %v61_v31, 2  ;;  %v84_v35 = vrot.slane %v83_v32, 2  ;;  %v130_v60 = vsel %vm128_vm7, %v126_v58, 1.0 }
  0x87   :  { %vm139_vm10 = vweird.f32 %v130_v60  ;;  %v145_v12 = vand.u32 2147483648, %v130_v60  ;;  %v143_v16 = vand.u32 2147483647, %v130_v60 }
  0x88   :  { %v63_v36 = vadd.f32 %v62_v34, %v61_v31  ;;  %v85_v37 = vadd.f32 %v84_v35, %v83_v32 }
  0x89   :  { %v146_v18 = vor.u32 1.1754944e-38, %v145_v12  ;;  %vm144_vm15 = vcmp.eq.f32.partialorder %v143_v16, 8.507059e+37 }
  0x8a   :  { %v64_v38 = vrot.slane %v63_v36, 1  ;;  %v86_v39 = vrot.slane %v85_v37, 1 }
  0x8c   :  { %v87_v41 = vadd.f32 %v86_v39, %v85_v37  ;;  %v65_v42 = vadd.f32 %v64_v38, %v63_v36  ;;  %v127_v57 = vld [vmem:[#allocation3 + $0x8] sm:$0x3] }
  0x8d   :  { %vm129_vm6 = vcmp.gt.f32.partialorder %v127_v57, 0.0 }
  0x8e   :  { %v66_v43 = vsub.f32 %v40_v40, %v65_v42  ;;  %v88_v44 = vsub.f32 %v40_v40, %v87_v41  ;;  %v131_v59 = vsel %vm129_vm6, %v127_v57, 1.0 }
  0x8f   :  { %209 = vrcp.f32 %v131_v59  ;;  %vm154_vm8 = vweird.f32 %v131_v59  ;;  %v158_v14 = vand.u32 2147483647, %v131_v59 }
  0x90   :  { %v89_v45 = vmul.f32 %v88_v44, %v88_v44  ;;  %v67_v46 = vmul.f32 %v66_v43, %v66_v43  ;;  %211 = vrcp.f32 %v130_v60 }
  0x91   :  { %vm159_vm14 = vcmp.eq.f32.partialorder %v158_v14, 8.507059e+37 }
  0x92   :  { %v91_v47 = vrot.slane %v89_v45, 1 }
  0x94   :  { %v93_v48 = vadd.f32 %v91_v47, %v67_v46 }
  0x95   :  { %v210_v61 = vpop.eup %209 }
  0x96   :  { %v96_v49 = vperm.slane %v93_v48, 0  ;;  %v212_v62 = vpop.eup %211  ;;  %v150_v63 = vmul.f32 %v210_v61, %v131_v59  ;;  %vm155_vm9 = vweird.f32 %v210_v61 }
  0x97   :  { %v135_v0 = vmul.f32 %v212_v62, %v130_v60  ;;  %vm140_vm11 = vweird.f32 %v212_v62  ;;  %vm156_vm12 = vmor %vm154_vm8, %vm155_vm9 }
  0x98   :  { %v98_v50 = vmul.f32 %v199_v11, %v96_v49  ;;  %v97_v51 = vmul.f32 %v198_v7, %v96_v49  ;;  %v151_v1 = vsub.f32 1.0, %v150_v63  ;;  %v160_v11 = vand.u32 2147483648, %v131_v59  ;;  %vm141_vm13 = vmor %vm139_vm10, %vm140_vm11 }
  0x99   :  { %v136_v2 = vsub.f32 1.0, %v135_v0 }
  0x9a   :  { %v102_v52 = vsel %vm57_vm3, %v98_v50, 0.0  ;;  %v99_v53 = vsel %vm55_vm0, %v97_v51, 0.0  ;;  %v152_v5 = vmul.f32 %v210_v61, %v151_v1  ;;  %v161_v17 = vor.u32 1.1754944e-38, %v160_v11 }
  0x9b   :  { %103 = vadd.xlane.f32.xlu1 %v102_v52  ;;  %100 = vadd.xlane.f32.xlu0 %v99_v53  ;;  %v137_v8 = vmul.f32 %v212_v62, %v136_v2 }
  0x9c   :  { %v153_v13 = vadd.f32 %v210_v61, %v152_v5 }
  0x9d   :  { %v138_v15 = vadd.f32 %v212_v62, %v137_v8 }
  0x9e   :  { %v157_v19 = vsel %vm156_vm12, %v210_v61, %v153_v13 }
  0x9f   :  { %v142_v20 = vsel %vm141_vm13, %v212_v62, %v138_v15  ;;  %v162_v22 = vsel %vm159_vm14, %v161_v17, %v157_v19 }
  0xa0   :  { %v147_v24 = vsel %vm144_vm15, %v146_v18, %v142_v20 }
 0x10e   :  { %v104_v6 = vpop.xlane.xlu1 %103  ;;  %v101_v7 = vpop.xlane.xlu0 %100 }
 0x10f   :  { %v106_v9 = vadd.f32 %v104_v6, %v95_v3  ;;  %v105_v10 = vadd.f32 %v101_v7, %v94_v4 }
 0x111   :  { %110 = vst.msk [vmem:[#allocation2 + $0x8] sm:$0x3] %vm25_vm5, %v106_v9 }
 0x112   :  { %108 = vst.msk [vmem:[#allocation2] sm:$0xff] %vm23_vm4, %v105_v10 }
 0x118   :  { %v133_v21 = vld [vmem:[#allocation2 + $0x8] sm:$0x3] }
 0x119   :  { %v132_v23 = vld [vmem:[#allocation2] sm:$0xff]  ;;  %v163_v25 = vmul.f32 %v162_v22, %v133_v21 }
 0x11a   :  { %v148_v26 = vmul.f32 %v147_v24, %v132_v23 }
 0x11b   :  { %v165_v27 = vsel %vm129_vm6, %v163_v25, 0.0 }
 0x11c   :  { %v164_v28 = vsel %vm128_vm7, %v148_v26, 0.0  ;;  %v169_v29 = vsel %vm25_vm5, %v165_v27, 0.0 }
 0x11d   :  { %v168_v30 = vsel %vm23_vm4, %v164_v28, 0.0 }
 0x11e   :  { %v170_v31 = vadd.f32 %v169_v29, %v168_v30 }
 0x120   :  { %171 = vadd.xlane.f32.xlu2 %v170_v31 }
 0x193   :  { %v172_v32 = vpop.xlane.xlu2 %171 }
 0x194   :  { %v173_v33 = vrot.slane %v172_v32, 4 }
 0x196   :  { %v174_v34 = vadd.f32 %v173_v33, %v172_v32 }
 0x198   :  { %v175_v35 = vrot.slane %v174_v34, 2 }
 0x19a   :  { %v176_v36 = vadd.f32 %v175_v35, %v174_v34 }
 0x19c   :  { %v177_v37 = vrot.slane %v176_v36, 1 }
 0x19e   :  { %v178_v38 = vadd.f32 %v177_v37, %v176_v36 }
 0x1a0   :  { %200 = vpush %v178_v38 }
 0x1d1   :  { %s201_s26 = spop %200 }
 0x1d2   :  { %s180_s27 = smul.f32 %s201_s26, %s167_s22 }
 0x1d4   :  { %182 = sst [smem:[#allocation5]] %s180_s27 }
 0x1d5   :  { %191 = dma.smem_to_hbm %s230_s28, 16, %s189_s25, [#allocation6]  }
 0x1d6   :  { %225 = dma.done.wait [#allocation6], 16  }
 0x1d7   :  { %226 = vsyncadd [#allocation6], 4294967280 }
 0x1d8   :  { %196 = sfence }
 0x1d9   :  { %197 = vsyncpa [#allocation6], 1 }

</bundles_post_ra>
